<compile_context>
chip_gen: v7x
topology: tpu7x:2x2x1
jax: 0.10.0
libtpu: 0.0.40
codegen_flags: <defaults>
</compile_context>

<pallas_src>
import jax
import jax.numpy as jnp
from jax.experimental import pallas as pl
from jax.experimental.pallas import tpu as pltpu


def _round_up(x, m):
    return ((x + m - 1) // m) * m


def _generator_kernel(x_ref, w1_ref, b1_ref, w2_ref, b2_ref, o_ref):
    # Cast the streamed f32 activations to the weight compute dtype (bf16 by
    # default) inside the kernel; both matmuls accumulate in f32 on the MXU.
    x = x_ref[...].astype(w1_ref.dtype)
    h = jnp.dot(x, w1_ref[...], preferred_element_type=jnp.float32)
    h = h + b1_ref[...]                      # bias in f32 (VPU)
    h = jnp.maximum(h, 0.1 * h)              # LeakyReLU(0.1): mul + max
    y = jnp.dot(h.astype(w2_ref.dtype), w2_ref[...],
                preferred_element_type=jnp.float32)
    y = y + b2_ref[...]
    o_ref[...] = jnp.maximum(y, 0.0).astype(o_ref.dtype)   # ReLU


def prepare_generator_params(w1, b1, w2, b2, compute_dtype=jnp.bfloat16):
    """One-time parameter prep: cast weights to the MXU compute dtype and
    reshape biases to [1, features] f32.  Do this once (outside the per-step
    forward) so the forward pass does no weight pad/cast HBM round-trips.

    Use compute_dtype=jnp.float32 for strict f32 parity with PyTorch
    (costs extra MXU passes)."""
    hidden = w1.shape[1]
    img_dim = w2.shape[1]
    return (w1.astype(compute_dtype),
            jnp.reshape(b1, (1, hidden)).astype(jnp.float32),
            w2.astype(compute_dtype),
            jnp.reshape(b2, (1, img_dim)).astype(jnp.float32))


def generator_forward(x, w1, b1, w2, b2, *, bm=1024, out_dtype=jnp.float32):
    """Fused MLP forward (Generator.gen_net) as a single Pallas kernel.

    x:  [B, latent_dim] float32
    w1: [latent_dim, 256] (compute dtype), b1: [1, 256] float32
    w2: [256, img_dim]    (compute dtype), b2: [1, img_dim] float32
    returns: [B, img_dim] `out_dtype` (float32 by default; pass bf16 to halve
             the dominant output-store HBM traffic if downstream tolerates it).
    """
    B, latent_dim = x.shape
    hidden = w1.shape[1]
    img_dim = w2.shape[1]
    assert b1.shape == (1, hidden) and b2.shape == (1, img_dim), \
        "call prepare_generator_params() first"

    in_bytes = jnp.dtype(x.dtype).itemsize
    w_bytes = jnp.dtype(w1.dtype).itemsize
    out_bytes = jnp.dtype(out_dtype).itemsize

    # --- Batch tile selection -----------------------------------------------
    # Multiple of 16 (sublane packing for any sub-f32 output), capped by batch.
    bm = max(16, min(int(bm), _round_up(B, 16)))
    bm = (bm // 16) * 16

    # Conservative VMEM budget: double-buffered x/out tiles + resident
    # (double-buffered) weights + f32 intermediates.  12 MiB keeps the tiling
    # under v5e's 16 MiB default scoped VMEM limit; v6e/v7x have more headroom.
    def _vmem_est(tile):
        stream = 2 * tile * latent_dim * in_bytes + 2 * tile * img_dim * out_bytes
        weights = 2 * (latent_dim * hidden * w_bytes + hidden * img_dim * w_bytes
                       + (hidden + img_dim) * 4)
        interm = tile * hidden * 4 + tile * img_dim * 4
        return stream + weights + interm

    while bm > 16 and _vmem_est(bm) > 12 * 2**20:
        bm = max(16, (bm // 2 // 16) * 16)

    # Keep >=4 grid steps when the batch allows it: the "parallel" batch axis
    # shards across v7x's two TensorCores, and >=2 steps per core restores
    # steady-state DMA/compute double-buffer overlap.
    while bm > 128 and pl.cdiv(B, bm) < 4:
        bm = max(16, (bm // 2 // 16) * 16)

    B_p = _round_up(B, bm)
    xp = x if B_p == B else jnp.pad(x, ((0, B_p - B), (0, 0)))
    grid = (B_p // bm,)

    cost = pl.CostEstimate(
        flops=2 * B_p * (latent_dim * hidden + hidden * img_dim),
        transcendentals=0,
        bytes_accessed=(B_p * latent_dim * in_bytes
                        + (latent_dim * hidden + hidden * img_dim) * w_bytes
                        + (hidden + img_dim) * 4
                        + B_p * img_dim * out_bytes),
    )

    out = pl.pallas_call(
        _generator_kernel,
        out_shape=jax.ShapeDtypeStruct((B_p, img_dim), out_dtype),
        grid_spec=pl.GridSpec(
            grid=grid,
            in_specs=[
                # x tile (streamed); full latent_dim last dim (no K padding —
                # the MXU pads K internally at zero HBM cost).
                pl.BlockSpec((bm, latent_dim), lambda i: (i, 0)),
                pl.BlockSpec((latent_dim, hidden), lambda i: (0, 0)),  # W1
                pl.BlockSpec((1, hidden), lambda i: (0, 0)),           # b1
                pl.BlockSpec((hidden, img_dim), lambda i: (0, 0)),     # W2
                pl.BlockSpec((1, img_dim), lambda i: (0, 0)),          # b2
            ],
            # Full img_dim last dim: no output column padding, no pad+slice
            # round-trip (only the tail vreg store is masked when img_dim%128).
            out_specs=pl.BlockSpec((bm, img_dim), lambda i: (i, 0)),
        ),
        compiler_params=pltpu.CompilerParams(
            dimension_semantics=("parallel",),
        ),
        cost_estimate=cost,
    )(xp, w1, b1, w2, b2)

    return out if B_p == B else out[:B]


def init_generator_params(key, latent_dim, img_dim, hidden=256):
    """Deterministic init mimicking nn.Linear's U(-1/sqrt(fan_in), 1/sqrt(fan_in))."""
    k1, k2, k3, k4 = jax.random.split(key, 4)
    bound1 = 1.0 / (latent_dim ** 0.5)
    bound2 = 1.0 / (hidden ** 0.5)
    w1 = jax.random.uniform(k1, (latent_dim, hidden), jnp.float32, -bound1, bound1)
    b1 = jax.random.uniform(k2, (1, hidden), jnp.float32, -bound1, bound1)
    w2 = jax.random.uniform(k3, (hidden, img_dim), jnp.float32, -bound2, bound2)
    b2 = jax.random.uniform(k4, (1, img_dim), jnp.float32, -bound2, bound2)
    return w1, b1, w2, b2


def generator_ref(x, w1, b1, w2, b2, compute_dtype=jnp.bfloat16):
    """Pure-JAX reference using the same bf16 matmul / f32 accumulation recipe.

    For strict float32 parity with PyTorch, pass compute_dtype=jnp.float32 to
    both this and prepare_generator_params (or use Precision.HIGHEST)."""
    h = jnp.dot(x.astype(compute_dtype), w1.astype(compute_dtype),
                preferred_element_type=jnp.float32)
    h = h + jnp.reshape(b1, (1, -1)).astype(jnp.float32)
    h = jnp.maximum(h, 0.1 * h)
    y = jnp.dot(h.astype(compute_dtype), w2.astype(compute_dtype),
                preferred_element_type=jnp.float32)
    y = y + jnp.reshape(b2, (1, -1)).astype(jnp.float32)
    return jnp.maximum(y, 0.0)


if __name__ == "__main__":
    latent_dim = 64
    img_dim = 200   # deliberately NOT a multiple of 128: full-array last dim block
    batch = 32

    key = jax.random.PRNGKey(0)
    k_x, k_p = jax.random.split(key)
    x = jax.random.normal(k_x, (batch, latent_dim), jnp.float32)
    w1, b1, w2, b2 = init_generator_params(k_p, latent_dim, img_dim)

    # One-time parameter prep (cast/reshape) outside the per-step forward.
    w1p, b1p, w2p, b2p = prepare_generator_params(w1, b1, w2, b2)

    out = generator_forward(x, w1p, b1p, w2p, b2p)
    out = jax.block_until_ready(out)

    ref = generator_ref(x, w1, b1, w2, b2)
    assert out.shape == (batch, img_dim)
    assert jnp.allclose(out, ref, atol=1e-2, rtol=1e-2), "mismatch vs reference"

    print("KERNEL_OK")
</pallas_src>

<mosaic_0001>
module attributes {stable_mosaic.version = 11 : i64} {
  func.func @_generator_kernel(%arg0: i32, %arg1: memref<32x64xf32, #tpu.memory_space<vmem>>, %arg2: memref<64x256xbf16, #tpu.memory_space<vmem>>, %arg3: memref<1x256xf32, #tpu.memory_space<vmem>>, %arg4: memref<256x200xbf16, #tpu.memory_space<vmem>>, %arg5: memref<1x200xf32, #tpu.memory_space<vmem>>, %arg6: memref<32x200xf32, #tpu.memory_space<vmem>>) attributes {dimension_semantics = [#tpu.dimension_semantics<parallel>], iteration_bounds = array<i64: 1>, scalar_prefetch = 0 : i64, scratch_operands = 0 : i64, tpu.core_type = #tpu.core_type<tc>, window_params = [{transform_indices = @transform_0, window_bounds = array<i64: 32, 64>}, {pipeline_mode = #tpu.pipeline_mode<synchronous>, transform_indices = @transform_1, window_bounds = array<i64: 64, 256>}, {pipeline_mode = #tpu.pipeline_mode<synchronous>, transform_indices = @transform_2, window_bounds = array<i64: 1, 256>}, {pipeline_mode = #tpu.pipeline_mode<synchronous>, transform_indices = @transform_3, window_bounds = array<i64: 256, 200>}, {pipeline_mode = #tpu.pipeline_mode<synchronous>, transform_indices = @transform_4, window_bounds = array<i64: 1, 200>}, {transform_indices = @transform_5, window_bounds = array<i64: 32, 200>}]} {
    %c0 = arith.constant 0 : index
    %c0_0 = arith.constant 0 : index
    %0 = vector.load %arg1[%c0, %c0_0] : memref<32x64xf32, #tpu.memory_space<vmem>>, vector<32x64xf32>
    %1 = arith.truncf %0 : vector<32x64xf32> to vector<32x64xbf16>
    %c0_1 = arith.constant 0 : index
    %c0_2 = arith.constant 0 : index
    %2 = vector.load %arg2[%c0_1, %c0_2] : memref<64x256xbf16, #tpu.memory_space<vmem>>, vector<64x256xbf16>
    %cst = arith.constant dense<0.000000e+00> : vector<32x256xf32>
    %3 = tpu.matmul %1, %2, %cst {dimension_numbers = #tpu.dot_dimension_numbers<[1], [0], [0], [1], [0, 0, 1, 1], [], []>} : vector<32x64xbf16>, vector<64x256xbf16>, vector<32x256xf32> -> vector<32x256xf32>
    %c0_3 = arith.constant 0 : index
    %c0_4 = arith.constant 0 : index
    %4 = vector.load %arg3[%c0_3, %c0_4] : memref<1x256xf32, #tpu.memory_space<vmem>>, vector<1x256xf32>
    %5 = vector.broadcast %4 : vector<1x256xf32> to vector<32x256xf32>
    %6 = arith.addf %3, %5 : vector<32x256xf32>
    %cst_5 = arith.constant 1.000000e-01 : f32
    %7 = vector.broadcast %cst_5 : f32 to vector<32x256xf32>
    %8 = arith.mulf %7, %6 : vector<32x256xf32>
    %9 = arith.maximumf %6, %8 : vector<32x256xf32>
    %10 = arith.truncf %9 : vector<32x256xf32> to vector<32x256xbf16>
    %c0_6 = arith.constant 0 : index
    %c0_7 = arith.constant 0 : index
    %11 = vector.load %arg4[%c0_6, %c0_7] : memref<256x200xbf16, #tpu.memory_space<vmem>>, vector<256x200xbf16>
    %cst_8 = arith.constant dense<0.000000e+00> : vector<32x200xf32>
    %12 = tpu.matmul %10, %11, %cst_8 {dimension_numbers = #tpu.dot_dimension_numbers<[1], [0], [0], [1], [0, 0, 1, 1], [], []>} : vector<32x256xbf16>, vector<256x200xbf16>, vector<32x200xf32> -> vector<32x200xf32>
    %c0_9 = arith.constant 0 : index
    %c0_10 = arith.constant 0 : index
    %13 = vector.load %arg5[%c0_9, %c0_10] : memref<1x200xf32, #tpu.memory_space<vmem>>, vector<1x200xf32>
    %14 = vector.broadcast %13 : vector<1x200xf32> to vector<32x200xf32>
    %15 = arith.addf %12, %14 : vector<32x200xf32>
    %cst_11 = arith.constant 0.000000e+00 : f32
    %16 = vector.broadcast %cst_11 : f32 to vector<32x200xf32>
    %17 = arith.maximumf %15, %16 : vector<32x200xf32>
    %c0_12 = arith.constant 0 : index
    %c0_13 = arith.constant 0 : index
    %18 = vector.load %arg6[%c0_12, %c0_13] : memref<32x200xf32, #tpu.memory_space<vmem>>, vector<32x200xf32>
    tpu.vector_store %arg6[%c0_12, %c0_13], %17 {strides = array<i32>} : memref<32x200xf32, #tpu.memory_space<vmem>>, vector<32x200xf32>,
    return
  }
  func.func @transform_0(%arg0: i32) -> (i32, i32) {
    %c0_i32 = arith.constant 0 : i32
    %c0_i32_0 = arith.constant 0 : i32
    return %arg0, %c0_i32 : i32, i32
  }
  func.func @transform_1(%arg0: i32) -> (i32, i32) {
    %c0_i32 = arith.constant 0 : i32
    %c0_i32_0 = arith.constant 0 : i32
    %c0_i32_1 = arith.constant 0 : i32
    return %c0_i32, %c0_i32_0 : i32, i32
  }
  func.func @transform_2(%arg0: i32) -> (i32, i32) {
    %c0_i32 = arith.constant 0 : i32
    %c0_i32_0 = arith.constant 0 : i32
    %c0_i32_1 = arith.constant 0 : i32
    return %c0_i32, %c0_i32_0 : i32, i32
  }
  func.func @transform_3(%arg0: i32) -> (i32, i32) {
    %c0_i32 = arith.constant 0 : i32
    %c0_i32_0 = arith.constant 0 : i32
    %c0_i32_1 = arith.constant 0 : i32
    return %c0_i32, %c0_i32_0 : i32, i32
  }
  func.func @transform_4(%arg0: i32) -> (i32, i32) {
    %c0_i32 = arith.constant 0 : i32
    %c0_i32_0 = arith.constant 0 : i32
    %c0_i32_1 = arith.constant 0 : i32
    return %c0_i32, %c0_i32_0 : i32, i32
  }
  func.func @transform_5(%arg0: i32) -> (i32, i32) {
    %c0_i32 = arith.constant 0 : i32
    %c0_i32_0 = arith.constant 0 : i32
    return %arg0, %c0_i32 : i32, i32
  }
}

</mosaic_0001>

<bundles_post_ra>
// kernel: tpu_custom_call.1
= control target key start
LH: loop header
LB: loop body
LE: loop exit
PB: predicated region body
PF: predicated region fallthrough
CT: control target
= control target key end

     0   :  { %v588_v2 = vmov 0   ;;  %vm88_vm0 = vcmask 523264   ;;  %s778_s0 = inlined_call_operand.vmem [shape: f32[32,64], index: 0, kind: input, shape index: {}]   ;;  %s779_s1 = inlined_call_operand.vmem [shape: bf16[64,256], index: 1, kind: input, shape index: {}]   ;;  %s780_s2 = inlined_call_operand.vmem [shape: f32[1,256], index: 2, kind: input, shape index: {}]   ;;  %s781_s3 = inlined_call_operand.vmem [shape: bf16[256,200], index: 3, kind: input, shape index: {}]   ;;  %s782_s4 = inlined_call_operand.vmem [shape: f32[1,200], index: 4, kind: input, shape index: {}]   ;;  %s783_s5 = inlined_call_operand.hbm [shape: f32[32,200], index: 5, kind: output, shape index: {}]  }
   0x1   :  { %v504_v0 = vld [vmem:[%s779_s1 + $0x4] ss:$8 sps:$4 sm:$0xff]   ;;  %v506_v1 = vld [vmem:[%s779_s1] ss:$8 sps:$4 sm:$0xff]   ;;  %127 = vmatprep.mubr.bf16.mxu0 %v588_v2  ;;  %v507_v3 = vld [vmem:[%s779_s1 + $0x14] ss:$8 sps:$4 sm:$0xff]  }
   0x2   :  { %95 = vmatprep.subr.bf16.mxu0 %v504_v0  ;;  %v509_v4 = vld [vmem:[%s779_s1 + $0x10] ss:$8 sps:$4 sm:$0xff]   ;;  %v510_v5 = vld [vmem:[%s779_s1 + $0x24] ss:$8 sps:$4 sm:$0xff]   ;;  %v512_v6 = vld [vmem:[%s779_s1 + $0x20] ss:$8 sps:$4 sm:$0xff]  }
   0x3   :  { %96 = vmatpush1.bf16.msra.mxu0 %v506_v1  ;;  %v513_v7 = vld [vmem:[%s779_s1 + $0x34] ss:$8 sps:$4 sm:$0xff]   ;;  %v516_v8 = vld [vmem:[%s781_s3 + $0x4] ss:$8 sps:$4 sm:$0xff]   ;;  %v518_v9 = vld [vmem:[%s781_s3] ss:$8 sps:$4 sm:$0xff]  }
   0x4   :  { %97 = vmatprep.subr.bf16.mxu0 %v507_v3  ;;  %v519_v10 = vld [vmem:[%s781_s3 + $0x14] ss:$8 sps:$4 sm:$0xff]   ;;  %v515_v11 = vld [vmem:[%s779_s1 + $0x30] ss:$8 sps:$4 sm:$0xff]   ;;  %372 = vmatprep.subr.bf16.mxu1 %v516_v8  ;;  %v22_v12 = vld [vmem:[%s778_s0] sm:$0xff] }
   0x5   :  { %373 = vmatpush1.bf16.msra.mxu1 %v518_v9  ;;  %v521_v13 = vld [vmem:[%s781_s3 + $0x10] ss:$8 sps:$4 sm:$0xff]   ;;  %v23_v14 = vld [vmem:[%s778_s0 + $0x8] sm:$0xff]  ;;  %v525_v18 = vld [vmem:[%s781_s3 + $0x34] ss:$8 sps:$4 sm:$0xff]  }
   0x6   :  { %374 = vmatprep.subr.bf16.mxu1 %v519_v10  ;;  %v522_v15 = vld [vmem:[%s781_s3 + $0x24] ss:$8 sps:$4 sm:$0xff]   ;;  %v26_v16 = vpack.c.bf16 %v23_v14, %v22_v12  ;;  %v524_v17 = vld [vmem:[%s781_s3 + $0x20] ss:$8 sps:$4 sm:$0xff]   ;;  %v24_v19 = vld [vmem:[%s778_s0 + $0x10] sm:$0xff] }
   0x7   :  { %98 = vmatpush1.bf16.msra.mxu0 %v509_v4  ;;  %v527_v20 = vld [vmem:[%s781_s3 + $0x30] ss:$8 sps:$4 sm:$0xff]   ;;  %v528_v22 = vld [vmem:[%s781_s3 + $0x44] ss:$8 sps:$4 sm:$0xff]   ;;  %v530_v24 = vld [vmem:[%s781_s3 + $0x40] ss:$8 sps:$4 sm:$0xff]  }
   0x8   :  { %99 = vmatprep.subr.bf16.mxu0 %v510_v5  ;;  %v25_v21 = vld [vmem:[%s778_s0 + $0x18] sm:$0xff] }
   0x9   :  { %375 = vmatpush1.bf16.msra.mxu1 %v521_v13  ;;  %v27_v23 = vpack.c.bf16 %v25_v21, %v24_v19  ;;  %v531_v25 = vld [vmem:[%s781_s3 + $0x54] ss:$8 sps:$4 sm:$0xff]   ;;  %v533_v26 = vld [vmem:[%s781_s3 + $0x50] ss:$8 sps:$4 sm:$0xff]  }
   0xa   :  { %376 = vmatprep.subr.bf16.mxu1 %v522_v15 }
   0xb   :  { %100 = vmatpush1.bf16.msra.mxu0 %v512_v6 }
   0xc   :  { %101 = vmatprep.subr.bf16.mxu0 %v513_v7 }
   0xd   :  { %377 = vmatpush1.bf16.msra.mxu1 %v524_v17 }
   0xe   :  { %378 = vmatprep.subr.bf16.mxu1 %v525_v18 }
   0xf   :  { %102 = vmatpush1.bf16.msra.mxu0 %v515_v11 }
  0x11   :  { %379 = vmatpush1.bf16.msra.mxu1 %v527_v20 }
  0x12   :  { %466 = vmatmul.mubr.msk.bf16.vlgmr.msra.gmra.mrb[0].mxu0 %vm88_vm0, %v26_v16  ;;  %380 = vmatprep.subr.bf16.mxu1 %v528_v22 }
  0x13   :  { %137 = vmatprep.mubr.bf16.mxu0 %v588_v2 }
  0x15   :  { %381 = vmatpush1.bf16.msra.mxu1 %v530_v24 }
  0x1a   :  { %467 = vmatmul.mubr.msk.bf16.gmra.mrb[4].mxu0 %vm88_vm0, %v27_v23 }
  0x1b   :  { %10 = vsyncpa [#allocation3], 0  ;;  %382 = vmatprep.subr.bf16.mxu1 %v531_v25  ;;  %v534_v27 = vld [vmem:[%s781_s3 + $0x64] ss:$8 sps:$4 sm:$0xff]   ;;  %v536_v28 = vld [vmem:[%s781_s3 + $0x60] ss:$8 sps:$4 sm:$0xff]   ;;  %v38_v47 = vlaneseq }
  0x1c   :  { %383 = vmatpush1.bf16.msra.mxu1 %v533_v26  ;;  %v537_v29 = vld [vmem:[%s781_s3 + $0x74] ss:$8 sps:$4 sm:$0xff]   ;;  %v539_v30 = vld [vmem:[%s781_s3 + $0x70] ss:$8 sps:$4 sm:$0xff]   ;;  %v540_v31 = vld [vmem:[%s781_s3 + $0x84] ss:$8 sps:$4 sm:$0xff]  }
  0x1d   :  { %384 = vmatprep.subr.bf16.mxu1 %v534_v27  ;;  %v542_v32 = vld [vmem:[%s781_s3 + $0x80] ss:$8 sps:$4 sm:$0xff]   ;;  %v543_v33 = vld [vmem:[%s781_s3 + $0x94] ss:$8 sps:$4 sm:$0xff]   ;;  %v545_v34 = vld [vmem:[%s781_s3 + $0x90] ss:$8 sps:$4 sm:$0xff]  }
  0x1e   :  { %v546_v35 = vld [vmem:[%s781_s3 + $0xa4] ss:$8 sps:$4 sm:$0xff]   ;;  %v548_v36 = vld [vmem:[%s781_s3 + $0xa0] ss:$8 sps:$4 sm:$0xff]   ;;  %v549_v37 = vld [vmem:[%s781_s3 + $0xb4] ss:$8 sps:$4 sm:$0xff]  }
  0x1f   :  { %v551_v38 = vld [vmem:[%s781_s3 + $0xb0] ss:$8 sps:$4 sm:$0xff]   ;;  %v552_v39 = vld [vmem:[%s781_s3 + $0xc4] ss:$8 sps:$4 sm:$0xff]   ;;  %v554_v40 = vld [vmem:[%s781_s3 + $0xc0] ss:$8 sps:$4 sm:$0xff]  }
  0x20   :  { %385 = vmatpush1.bf16.msra.mxu1 %v536_v28  ;;  %v555_v41 = vld [vmem:[%s781_s3 + $0xd4] ss:$8 sps:$4 sm:$0xff]   ;;  %v557_v42 = vld [vmem:[%s781_s3 + $0xd0] ss:$8 sps:$4 sm:$0xff]   ;;  %v558_v43 = vld [vmem:[%s781_s3 + $0xe4] ss:$8 sps:$4 sm:$0xff]  }
  0x21   :  { %386 = vmatprep.subr.bf16.mxu1 %v537_v29  ;;  %v560_v44 = vld [vmem:[%s781_s3 + $0xe0] ss:$8 sps:$4 sm:$0xff]   ;;  %v561_v45 = vld [vmem:[%s781_s3 + $0xf4] ss:$8 sps:$4 sm:$0xff]   ;;  %v563_v46 = vld [vmem:[%s781_s3 + $0xf0] ss:$8 sps:$4 sm:$0xff]  }
  0x22   :  { %v39_v48 = vshrl.u32 %v38_v47, 7  ;;  %v36_v50 = vld [vmem:[%s780_s2] sm:$0x3]  ;;  %vm434_vm1 = vcmask 588800  }
  0x23   :  { %v200_v26 = vld [vmem:[%s782_s4] sm:$0x3]  ;;  %s589_s4 = smov [#allocation2]  }
  0x24   :  { %387 = vmatpush1.bf16.msra.mxu1 %v539_v30  ;;  %v40_v49 = vsub.s32 0, %v39_v48  ;;  %v44_v51 = vsub.s32 1, %v39_v48  ;;  %s447_s28 = sshll.u32 %s589_s4, 4  ;;  %s448_s28 = int_to_ptr.vmem [resolvable:$true] %s447_s28 }
  0x25   :  { %388 = vmatprep.subr.bf16.mxu1 %v540_v31  ;;  %s564_s29 = scalar_lea.vmem %s448_s28, 1024  ;;  %p569_p1 = scmp.lt.s32.totalorder %s448_s28, %s448_s28 }
  0x26   :  { %v41_v52 = vrot.slane %v36_v50, %v40_v49  ;;  %v45_v53 = vrot.slane %v36_v50, %v44_v51  ;;  %v205_v27 = vrot.slane %v200_v26, %v40_v49  ;;  %v209_v28 = vrot.slane %v200_v26, %v44_v51  ;;  %p565_p0 = scmp.ne.s32.totalorder %s448_s28, %s564_s29  ;;  %p570_p2 = scmp.lt.s32.totalorder %s564_s29, %s564_s29 }
  0x28   :  { %389 = vmatpush1.bf16.msra.mxu1 %v542_v32  ;;  %p571_p3 = por %p570_p2, %p569_p1 }
  0x29   :  { %390 = vmatprep.subr.bf16.mxu1 %v543_v33 }
  0x2a   :  { %p572_p4 = pnand %p571_p3, %p565_p0 }
  0x2c   :  { %391 = vmatpush1.bf16.msra.mxu1 %v545_v34 }
  0x2d   :  { %392 = vmatprep.subr.bf16.mxu1 %v546_v35 }
  0x30   :  { %393 = vmatpush1.bf16.msra.mxu1 %v548_v36 }
  0x31   :  { %394 = vmatprep.subr.bf16.mxu1 %v549_v37 }
  0x34   :  { %395 = vmatpush1.bf16.msra.mxu1 %v551_v38 }
  0x35   :  { %396 = vmatprep.subr.bf16.mxu1 %v552_v39 }
  0x38   :  { %397 = vmatpush1.bf16.msra.mxu1 %v554_v40 }
  0x39   :  { %398 = vmatprep.subr.bf16.mxu1 %v555_v41 }
  0x3c   :  { %399 = vmatpush1.bf16.msra.mxu1 %v557_v42 }
  0x3d   :  { %400 = vmatprep.subr.bf16.mxu1 %v558_v43 }
  0x40   :  { %401 = vmatpush1.bf16.msra.mxu1 %v560_v44 }
  0x41   :  { %402 = vmatprep.subr.bf16.mxu1 %v561_v45 }
  0x44   :  { %403 = vmatpush1.bf16.msra.mxu1 %v563_v46 }
  0xe5   :  { %v129_v54 = vpop.f32.mrb[0].mxu0 }
  0xe6   :  { %v130_v55 = vadd.f32 %v129_v54, %v41_v52  ;;  %v131_v56 = vpop.f32.mrb[1].mxu0 }
  0xe7   :  { %v132_v57 = vadd.f32 %v131_v56, %v45_v53  ;;  %v133_v58 = vpop.f32.mrb[2].mxu0 }
  0xe8   :  { %v148_v59 = vmul.f32 0.1, %v130_v55  ;;  %v134_v60 = vadd.f32 %v133_v58, %v41_v52  ;;  %v135_v61 = vpop.f32.mrb[3].mxu0 }
  0xe9   :  { %v149_v62 = vmul.f32 0.1, %v132_v57  ;;  %v136_v63 = vadd.f32 %v135_v61, %v45_v53 }
  0xea   :  { %v150_v0 = vmul.f32 0.1, %v134_v60  ;;  %v156_v2 = vmax.f32 %v130_v55, %v148_v59 }
  0xeb   :  { %v151_v1 = vmul.f32 0.1, %v136_v63  ;;  %v157_v5 = vmax.f32 %v132_v57, %v149_v62 }
  0xec   :  { %v158_v3 = vmax.f32 %v134_v60, %v150_v0 }
  0xed   :  { %v139_v4 = vpop.f32.mrb[4].mxu0  ;;  %v159_v6 = vmax.f32 %v136_v63, %v151_v1 }
  0xee   :  { %v140_v7 = vadd.f32 %v139_v4, %v41_v52  ;;  %v141_v8 = vpop.f32.mrb[5].mxu0  ;;  %v164_v9 = vpack.c.bf16 %v158_v3, %v156_v2 }
  0xef   :  { %v142_v10 = vadd.f32 %v141_v8, %v45_v53  ;;  %v143_v11 = vpop.f32.mrb[6].mxu0  ;;  %v165_v12 = vpack.c.bf16 %v159_v6, %v157_v5 }
  0xf0   :  { %v152_v13 = vmul.f32 0.1, %v140_v7  ;;  %v144_v14 = vadd.f32 %v143_v11, %v41_v52  ;;  %v145_v15 = vpop.f32.mrb[7].mxu0 }
  0xf1   :  { %v153_v16 = vmul.f32 0.1, %v142_v10  ;;  %v146_v17 = vadd.f32 %v145_v15, %v45_v53  ;;  %404 = vmatprep.mubr.bf16.mxu1 %v165_v12 }
  0xf2   :  { %v154_v18 = vmul.f32 0.1, %v144_v14  ;;  %405 = vmatmul.mubr.bf16.vlgmr.msra.gmra.mrb[0].mxu1 %v164_v9  ;;  %v160_v20 = vmax.f32 %v140_v7, %v152_v13 }
  0xf3   :  { %v155_v19 = vmul.f32 0.1, %v146_v17  ;;  %v161_v22 = vmax.f32 %v142_v10, %v153_v16 }
  0xf4   :  { %v162_v21 = vmax.f32 %v144_v14, %v154_v18 }
  0xf5   :  { %v163_v23 = vmax.f32 %v146_v17, %v155_v19 }
  0xf6   :  { %v166_v24 = vpack.c.bf16 %v162_v21, %v160_v20 }
  0xf7   :  { %v167_v25 = vpack.c.bf16 %v163_v23, %v161_v22 }
  0xf9   :  { %414 = vmatprep.mubr.bf16.mxu1 %v167_v25 }
  0xfa   :  { %415 = vmatmul.mubr.bf16.gmra.mrb[4].mxu1 %v166_v24 }
 0x1c5   :  { %v406_v29 = vpop.f32.mrb[0].mxu1 }
 0x1c6   :  { %v407_v30 = vadd.f32 %v406_v29, %v205_v27  ;;  %v408_v31 = vpop.f32.mrb[1].mxu1 }
 0x1c7   :  { %v409_v32 = vadd.f32 %v408_v31, %v209_v28  ;;  %v410_v33 = vpop.f32.mrb[2].mxu1 }
 0x1c8   :  { %v425_v34 = vmax.f32 %v407_v30, 0.0  ;;  %v411_v35 = vadd.f32 %v410_v33, %v205_v27  ;;  %v412_v36 = vpop.f32.mrb[3].mxu1 }
 0x1c9   :  { %v426_v37 = vmax.f32 %v409_v32, 0.0  ;;  %v413_v38 = vadd.f32 %v412_v36, %v209_v28 }
 0x1ca   :  { %433 = vst [vmem:[#allocation2] sm:$0xff] %v425_v34  ;;  %v427_v39 = vmax.f32 %v411_v35, 0.0 }
 0x1cb   :  { %435 = vst.msk [vmem:[#allocation2 + $0x8] sm:$0xff] %vm434_vm1, %v426_v37  ;;  %v428_v40 = vmax.f32 %v413_v38, 0.0 }
 0x1cc   :  { %436 = vst [vmem:[#allocation2 + $0x10] sm:$0xff] %v427_v39 }
 0x1cd   :  { %437 = vst.msk [vmem:[#allocation2 + $0x18] sm:$0xff] %vm434_vm1, %v428_v40  ;;  %v416_v41 = vpop.f32.mrb[4].mxu1 }
 0x1ce   :  { %v417_v42 = vadd.f32 %v416_v41, %v205_v27  ;;  %v418_v43 = vpop.f32.mrb[5].mxu1 }
 0x1cf   :  { %v419_v44 = vadd.f32 %v418_v43, %v209_v28  ;;  %v420_v45 = vpop.f32.mrb[6].mxu1 }
 0x1d0   :  { %v429_v46 = vmax.f32 %v417_v42, 0.0  ;;  %v421_v47 = vadd.f32 %v420_v45, %v205_v27  ;;  %v422_v48 = vpop.f32.mrb[7].mxu1 }
 0x1d1   :  { %v430_v49 = vmax.f32 %v419_v44, 0.0  ;;  %v423_v50 = vadd.f32 %v422_v48, %v209_v28 }
 0x1d2   :  { %438 = vst [vmem:[#allocation2 + $0x20] sm:$0xff] %v429_v46  ;;  %v431_v51 = vmax.f32 %v421_v47, 0.0 }
 0x1d3   :  { %439 = vst.msk [vmem:[#allocation2 + $0x28] sm:$0xff] %vm434_vm1, %v430_v49  ;;  %v432_v52 = vmax.f32 %v423_v50, 0.0 }
 0x1d4   :  { %440 = vst [vmem:[#allocation2 + $0x30] sm:$0xff] %v431_v51 }
 0x1d5   :  { %441 = vst.msk [vmem:[#allocation2 + $0x38] sm:$0xff] %vm434_vm1, %v432_v52 }
 0x1d6   :  { %575 = shalt.err (!%p572_p4)
}
 0x1d7   :  { %s576_s7 = scalar_lea.hbm %s783_s5, 1024 }
 0x1d8   :  { %p577_p5 = scmp.ne.s32.totalorder %s783_s5, %s576_s7  ;;  %p580_p6 = scmp.lt.u32.totalorder %s576_s7, %s783_s5 }
 0x1da   :  { %p582_p7 = pnand %p580_p6, %p577_p5 }
 0x1dc   :  { %585 = shalt.err (!%p582_p7)
}
 0x1dd   :  { %s590_s12 = smov 256   ;;  %s591_s0 = smov 16  }
 0x1de   :  { %453 = dma.vmem_to_hbm [thread:$0]  %s448_s28, 1024, %s783_s5, [#allocation3], %s590_s12, %s590_s12, %s591_s0  }
 0x1df   :  { %586 = dma.done.wait [#allocation3], 1024  }
 0x1e0   :  { %587 = vsyncadd [#allocation3], 4294966272 }
 0x1e1   :  { %457 = vsyncpa [#allocation3], 1 }

</bundles_post_ra>
